<compile_context>
chip_gen: v7x
topology: tpu7x:2x2x1
jax: 0.10.0
libtpu: 0.0.40
codegen_flags: <defaults>
</compile_context>

<pallas_src>
import jax
import jax.numpy as jnp
from jax.experimental import pallas as pl
from jax.experimental.pallas import tpu as pltpu

SUBLANE = 8          # f32 sublane granularity -> batch-tile divisibility
MAX_TILE_B = 2048    # per-step VMEM footprint stays at a few MB even here
MIN_GRID_STEPS = 2   # v7x megacore: keep both TensorCores busy when B allows


def _round_up(x, m):
    return (x + m - 1) // m * m


def _choose_tile_b(B):
    """Adaptive batch tile: big (amortize ~600-cycle step overhead), >=2 steps
    when the batch allows (v7x megacore + DMA/compute overlap), and rebalanced
    so the last tile is not mostly padding."""
    B8 = _round_up(max(B, 1), SUBLANE)
    tile = min(MAX_TILE_B, max(SUBLANE, _round_up(pl.cdiv(B8, MIN_GRID_STEPS), SUBLANE)))
    n_steps = pl.cdiv(B8, tile)
    # Rebalance: spread rows evenly over the same number of steps (never
    # increases steps, never exceeds MAX_TILE_B, keeps multiple-of-8).
    tile = _round_up(pl.cdiv(B8, n_steps), SUBLANE)
    return tile


def critic_kernel(state_ref, action_ref,
                  w1s_ref, w1a_ref, b1_ref,
                  w2_ref, b2_ref,
                  w3_ref, b3_ref,
                  w4_ref, b4_ref,
                  out_ref):
    """4-layer MLP (Linear+ReLU x3, Linear) on one batch tile, all on MXU/VPU."""
    # Layer 1: torch.cat fused by splitting w1 over the state/action features.
    h = (jnp.dot(state_ref[...], w1s_ref[...], preferred_element_type=jnp.float32)
         + jnp.dot(action_ref[...], w1a_ref[...], preferred_element_type=jnp.float32)
         + b1_ref[...])
    h = jnp.maximum(h, 0.0)

    h = jnp.dot(h, w2_ref[...], preferred_element_type=jnp.float32) + b2_ref[...]
    h = jnp.maximum(h, 0.0)

    h = jnp.dot(h, w3_ref[...], preferred_element_type=jnp.float32) + b3_ref[...]
    h = jnp.maximum(h, 0.0)

    # Final layer: (tile_b, H) @ (H, 1) -> (tile_b, 1).  Only 4 B/row leave VMEM.
    q = jnp.dot(h, w4_ref[...], preferred_element_type=jnp.float32) + b4_ref[...]
    out_ref[...] = q.astype(out_ref.dtype)


def pack_critic_params(params, environment_states):
    """One-time packing: split w1 along its input axis (fuses the concat);
    biases already stored as [1, out]; w4/b4 kept at true width 1."""
    (w1, b1, w2, b2, w3, b3, w4, b4) = params
    w1s = w1[:environment_states, :]
    w1a = w1[environment_states:, :]
    return (w1s, w1a, b1, w2, b2, w3, b3, w4, b4)


def critic_forward(state, action, packed_params, *, tile_b=None):
    """Pallas critic forward.  Returns [B, 1] values, matching the PyTorch module."""
    (w1s, w1a, b1, w2, b2, w3, b3, w4, b4) = packed_params
    B, S = state.shape
    A = action.shape[1]
    H = w2.shape[0]

    if tile_b is None:
        tile_b = _choose_tile_b(B)
    tile_b = _round_up(max(tile_b, SUBLANE), SUBLANE)

    B_pad = _round_up(B, tile_b)
    if B_pad != B:
        state = jnp.pad(state, ((0, B_pad - B), (0, 0)))
        action = jnp.pad(action, ((0, B_pad - B), (0, 0)))

    grid = (B_pad // tile_b,)

    def act_spec(d):
        # Activation tile: walks the batch axis with the grid (auto-pipelined).
        return pl.BlockSpec((tile_b, d), lambda i: (i, 0))

    def const_spec(r, c):
        # Weight / bias: same block every grid step -> stays VMEM-resident.
        return pl.BlockSpec((r, c), lambda i: (0, 0))

    # Advisory cost hint (true FLOPs / bytes, no padded-lane inflation).
    flops = 2 * B_pad * (S * H + A * H + 2 * H * H + H * 1)
    param_bytes = 4 * (w1s.size + w1a.size + b1.size + w2.size + b2.size
                       + w3.size + b3.size + w4.size + b4.size)
    act_bytes = 4 * (B_pad * (S + A) + B_pad * 1)
    cost = pl.CostEstimate(flops=flops, transcendentals=0,
                           bytes_accessed=param_bytes + act_bytes)

    out = pl.pallas_call(
        critic_kernel,
        out_shape=jax.ShapeDtypeStruct((B_pad, 1), jnp.float32),
        grid=grid,
        in_specs=[
            act_spec(S), act_spec(A),
            const_spec(S, H), const_spec(A, H), const_spec(1, H),
            const_spec(H, H), const_spec(1, H),
            const_spec(H, H), const_spec(1, H),
            const_spec(H, 1), const_spec(1, 1),
        ],
        # Block (tile_b, 1): last dim equals the full array dim -> legal, and the
        # HBM writeback is only the real 4 B/row.
        out_specs=pl.BlockSpec((tile_b, 1), lambda i: (i, 0)),
        compiler_params=pltpu.CompilerParams(
            dimension_semantics=("parallel",),      # v7x: shard batch over both TCs
            vmem_limit_bytes=32 * 1024 * 1024,      # plenty of headroom on all gens
        ),
        cost_estimate=cost,
    )(state, action, w1s, w1a, b1, w2, b2, w3, b3, w4, b4)

    # Drop batch padding only (output is already 1 lane wide).
    return out[:B] if B_pad != B else out


def init_linear(key, fan_in, fan_out):
    """Deterministic init mimicking PyTorch nn.Linear default (uniform +/- 1/sqrt(fan_in))."""
    kw, kb = jax.random.split(key)
    bound = 1.0 / jnp.sqrt(jnp.float32(fan_in))
    w = jax.random.uniform(kw, (fan_in, fan_out), jnp.float32, -bound, bound)
    b = jax.random.uniform(kb, (1, fan_out), jnp.float32, -bound, bound)
    return w, b


def make_critic_params(key, environment_states, action_dim, hidden):
    k1, k2, k3, k4 = jax.random.split(key, 4)
    in_dim = environment_states + action_dim
    w1, b1 = init_linear(k1, in_dim, hidden)
    w2, b2 = init_linear(k2, hidden, hidden)
    w3, b3 = init_linear(k3, hidden, hidden)
    w4, b4 = init_linear(k4, hidden, 1)
    return (w1, b1, w2, b2, w3, b3, w4, b4)


def critic_reference(state, action, params):
    """Pure-JAX reference for correctness check (mirrors the PyTorch module)."""
    (w1, b1, w2, b2, w3, b3, w4, b4) = params
    sa = jnp.concatenate([state, action], axis=1)
    h = jnp.maximum(sa @ w1 + b1, 0.0)
    h = jnp.maximum(h @ w2 + b2, 0.0)
    h = jnp.maximum(h @ w3 + b3, 0.0)
    return h @ w4 + b4


if __name__ == "__main__":
    environment_states = 24
    action_dim = 8
    hidden = 32

    key = jax.random.PRNGKey(0)
    k_state, k_action, k_params = jax.random.split(key, 3)
    params = make_critic_params(k_params, environment_states, action_dim, hidden)
    packed = pack_critic_params(params, environment_states)   # one-time packing

    # Small, tile-aligned batch.
    batch = 8
    state = jax.random.normal(k_state, (batch, environment_states), jnp.float32)
    action = jax.random.normal(k_action, (batch, action_dim), jnp.float32)

    out = critic_forward(state, action, packed)
    out = jax.block_until_ready(out)
    ref = critic_reference(state, action, params)
    assert out.shape == (batch, 1), out.shape
    assert jnp.allclose(out, ref, atol=1e-5, rtol=1e-5), (out, ref)

    # Ragged batch (exercises remainder padding + multi-step grid + slice-back).
    batch2 = 13
    state2 = jax.random.normal(k_state, (batch2, environment_states), jnp.float32)
    action2 = jax.random.normal(k_action, (batch2, action_dim), jnp.float32)
    out2 = jax.block_until_ready(critic_forward(state2, action2, packed))
    ref2 = critic_reference(state2, action2, params)
    assert out2.shape == (batch2, 1), out2.shape
    assert jnp.allclose(out2, ref2, atol=1e-5, rtol=1e-5), (out2, ref2)

    print("KERNEL_OK")
</pallas_src>

<mosaic_0001>
module attributes {stable_mosaic.version = 11 : i64} {
  func.func @critic_kernel(%arg0: i32, %arg1: memref<8x24xf32, #tpu.memory_space<vmem>>, %arg2: memref<8x8xf32, #tpu.memory_space<vmem>>, %arg3: memref<24x32xf32, #tpu.memory_space<vmem>>, %arg4: memref<8x32xf32, #tpu.memory_space<vmem>>, %arg5: memref<1x32xf32, #tpu.memory_space<vmem>>, %arg6: memref<32x32xf32, #tpu.memory_space<vmem>>, %arg7: memref<1x32xf32, #tpu.memory_space<vmem>>, %arg8: memref<32x32xf32, #tpu.memory_space<vmem>>, %arg9: memref<1x32xf32, #tpu.memory_space<vmem>>, %arg10: memref<32x1xf32, #tpu.memory_space<vmem>>, %arg11: memref<1x1xf32, #tpu.memory_space<vmem>>, %arg12: memref<8x1xf32, #tpu.memory_space<vmem>>) attributes {dimension_semantics = [#tpu.dimension_semantics<parallel>], iteration_bounds = array<i64: 1>, scalar_prefetch = 0 : i64, scratch_operands = 0 : i64, tpu.core_type = #tpu.core_type<tc>, window_params = [{transform_indices = @transform_0, window_bounds = array<i64: 8, 24>}, {transform_indices = @transform_1, window_bounds = array<i64: 8, 8>}, {pipeline_mode = #tpu.pipeline_mode<synchronous>, transform_indices = @transform_2, window_bounds = array<i64: 24, 32>}, {pipeline_mode = #tpu.pipeline_mode<synchronous>, transform_indices = @transform_3, window_bounds = array<i64: 8, 32>}, {pipeline_mode = #tpu.pipeline_mode<synchronous>, transform_indices = @transform_4, window_bounds = array<i64: 1, 32>}, {pipeline_mode = #tpu.pipeline_mode<synchronous>, transform_indices = @transform_5, window_bounds = array<i64: 32, 32>}, {pipeline_mode = #tpu.pipeline_mode<synchronous>, transform_indices = @transform_6, window_bounds = array<i64: 1, 32>}, {pipeline_mode = #tpu.pipeline_mode<synchronous>, transform_indices = @transform_7, window_bounds = array<i64: 32, 32>}, {pipeline_mode = #tpu.pipeline_mode<synchronous>, transform_indices = @transform_8, window_bounds = array<i64: 1, 32>}, {pipeline_mode = #tpu.pipeline_mode<synchronous>, transform_indices = @transform_9, window_bounds = array<i64: 32, 1>}, {pipeline_mode = #tpu.pipeline_mode<synchronous>, transform_indices = @transform_10, window_bounds = array<i64: 1, 1>}, {transform_indices = @transform_11, window_bounds = array<i64: 8, 1>}]} {
    %c0 = arith.constant 0 : index
    %c0_0 = arith.constant 0 : index
    %0 = vector.load %arg1[%c0, %c0_0] : memref<8x24xf32, #tpu.memory_space<vmem>>, vector<8x24xf32>
    %c0_1 = arith.constant 0 : index
    %c0_2 = arith.constant 0 : index
    %1 = vector.load %arg3[%c0_1, %c0_2] : memref<24x32xf32, #tpu.memory_space<vmem>>, vector<24x32xf32>
    %cst = arith.constant dense<0.000000e+00> : vector<8x32xf32>
    %2 = tpu.matmul %0, %1, %cst {dimension_numbers = #tpu.dot_dimension_numbers<[1], [0], [0], [1], [0, 0, 1, 1], [], []>} : vector<8x24xf32>, vector<24x32xf32>, vector<8x32xf32> -> vector<8x32xf32>
    %c0_3 = arith.constant 0 : index
    %c0_4 = arith.constant 0 : index
    %3 = vector.load %arg2[%c0_3, %c0_4] : memref<8x8xf32, #tpu.memory_space<vmem>>, vector<8x8xf32>
    %c0_5 = arith.constant 0 : index
    %c0_6 = arith.constant 0 : index
    %4 = vector.load %arg4[%c0_5, %c0_6] : memref<8x32xf32, #tpu.memory_space<vmem>>, vector<8x32xf32>
    %cst_7 = arith.constant dense<0.000000e+00> : vector<8x32xf32>
    %5 = tpu.matmul %3, %4, %cst_7 {dimension_numbers = #tpu.dot_dimension_numbers<[1], [0], [0], [1], [0, 0, 1, 1], [], []>} : vector<8x8xf32>, vector<8x32xf32>, vector<8x32xf32> -> vector<8x32xf32>
    %6 = arith.addf %2, %5 : vector<8x32xf32>
    %c0_8 = arith.constant 0 : index
    %c0_9 = arith.constant 0 : index
    %7 = vector.load %arg5[%c0_8, %c0_9] : memref<1x32xf32, #tpu.memory_space<vmem>>, vector<1x32xf32>
    %8 = vector.broadcast %7 : vector<1x32xf32> to vector<8x32xf32>
    %9 = arith.addf %6, %8 : vector<8x32xf32>
    %cst_10 = arith.constant 0.000000e+00 : f32
    %10 = vector.broadcast %cst_10 : f32 to vector<8x32xf32>
    %11 = arith.maximumf %9, %10 : vector<8x32xf32>
    %c0_11 = arith.constant 0 : index
    %c0_12 = arith.constant 0 : index
    %12 = vector.load %arg6[%c0_11, %c0_12] : memref<32x32xf32, #tpu.memory_space<vmem>>, vector<32x32xf32>
    %cst_13 = arith.constant dense<0.000000e+00> : vector<8x32xf32>
    %13 = tpu.matmul %11, %12, %cst_13 {dimension_numbers = #tpu.dot_dimension_numbers<[1], [0], [0], [1], [0, 0, 1, 1], [], []>} : vector<8x32xf32>, vector<32x32xf32>, vector<8x32xf32> -> vector<8x32xf32>
    %c0_14 = arith.constant 0 : index
    %c0_15 = arith.constant 0 : index
    %14 = vector.load %arg7[%c0_14, %c0_15] : memref<1x32xf32, #tpu.memory_space<vmem>>, vector<1x32xf32>
    %15 = vector.broadcast %14 : vector<1x32xf32> to vector<8x32xf32>
    %16 = arith.addf %13, %15 : vector<8x32xf32>
    %cst_16 = arith.constant 0.000000e+00 : f32
    %17 = vector.broadcast %cst_16 : f32 to vector<8x32xf32>
    %18 = arith.maximumf %16, %17 : vector<8x32xf32>
    %c0_17 = arith.constant 0 : index
    %c0_18 = arith.constant 0 : index
    %19 = vector.load %arg8[%c0_17, %c0_18] : memref<32x32xf32, #tpu.memory_space<vmem>>, vector<32x32xf32>
    %cst_19 = arith.constant dense<0.000000e+00> : vector<8x32xf32>
    %20 = tpu.matmul %18, %19, %cst_19 {dimension_numbers = #tpu.dot_dimension_numbers<[1], [0], [0], [1], [0, 0, 1, 1], [], []>} : vector<8x32xf32>, vector<32x32xf32>, vector<8x32xf32> -> vector<8x32xf32>
    %c0_20 = arith.constant 0 : index
    %c0_21 = arith.constant 0 : index
    %21 = vector.load %arg9[%c0_20, %c0_21] : memref<1x32xf32, #tpu.memory_space<vmem>>, vector<1x32xf32>
    %22 = vector.broadcast %21 : vector<1x32xf32> to vector<8x32xf32>
    %23 = arith.addf %20, %22 : vector<8x32xf32>
    %cst_22 = arith.constant 0.000000e+00 : f32
    %24 = vector.broadcast %cst_22 : f32 to vector<8x32xf32>
    %25 = arith.maximumf %23, %24 : vector<8x32xf32>
    %c0_23 = arith.constant 0 : index
    %c0_24 = arith.constant 0 : index
    %26 = vector.load %arg10[%c0_23, %c0_24] : memref<32x1xf32, #tpu.memory_space<vmem>>, vector<32x1xf32>
    %cst_25 = arith.constant dense<0.000000e+00> : vector<8x1xf32>
    %27 = tpu.matmul %25, %26, %cst_25 {dimension_numbers = #tpu.dot_dimension_numbers<[1], [0], [0], [1], [0, 0, 1, 1], [], []>} : vector<8x32xf32>, vector<32x1xf32>, vector<8x1xf32> -> vector<8x1xf32>
    %c0_26 = arith.constant 0 : index
    %c0_27 = arith.constant 0 : index
    %28 = vector.load %arg11[%c0_26, %c0_27] : memref<1x1xf32, #tpu.memory_space<vmem>>, vector<1x1xf32>
    %29 = vector.broadcast %28 : vector<1x1xf32> to vector<8x1xf32>
    %30 = arith.addf %27, %29 : vector<8x1xf32>
    %c0_28 = arith.constant 0 : index
    %c0_29 = arith.constant 0 : index
    %31 = vector.load %arg12[%c0_28, %c0_29] : memref<8x1xf32, #tpu.memory_space<vmem>>, vector<8x1xf32>
    tpu.vector_store %arg12[%c0_28, %c0_29], %30 {strides = array<i32>} : memref<8x1xf32, #tpu.memory_space<vmem>>, vector<8x1xf32>,
    return
  }
  func.func @transform_0(%arg0: i32) -> (i32, i32) {
    %c0_i32 = arith.constant 0 : i32
    %c0_i32_0 = arith.constant 0 : i32
    return %arg0, %c0_i32 : i32, i32
  }
  func.func @transform_1(%arg0: i32) -> (i32, i32) {
    %c0_i32 = arith.constant 0 : i32
    %c0_i32_0 = arith.constant 0 : i32
    return %arg0, %c0_i32 : i32, i32
  }
  func.func @transform_2(%arg0: i32) -> (i32, i32) {
    %c0_i32 = arith.constant 0 : i32
    %c0_i32_0 = arith.constant 0 : i32
    %c0_i32_1 = arith.constant 0 : i32
    return %c0_i32, %c0_i32_0 : i32, i32
  }
  func.func @transform_3(%arg0: i32) -> (i32, i32) {
    %c0_i32 = arith.constant 0 : i32
    %c0_i32_0 = arith.constant 0 : i32
    %c0_i32_1 = arith.constant 0 : i32
    return %c0_i32, %c0_i32_0 : i32, i32
  }
  func.func @transform_4(%arg0: i32) -> (i32, i32) {
    %c0_i32 = arith.constant 0 : i32
    %c0_i32_0 = arith.constant 0 : i32
    %c0_i32_1 = arith.constant 0 : i32
    return %c0_i32, %c0_i32_0 : i32, i32
  }
  func.func @transform_5(%arg0: i32) -> (i32, i32) {
    %c0_i32 = arith.constant 0 : i32
    %c0_i32_0 = arith.constant 0 : i32
    %c0_i32_1 = arith.constant 0 : i32
    return %c0_i32, %c0_i32_0 : i32, i32
  }
  func.func @transform_6(%arg0: i32) -> (i32, i32) {
    %c0_i32 = arith.constant 0 : i32
    %c0_i32_0 = arith.constant 0 : i32
    %c0_i32_1 = arith.constant 0 : i32
    return %c0_i32, %c0_i32_0 : i32, i32
  }
  func.func @transform_7(%arg0: i32) -> (i32, i32) {
    %c0_i32 = arith.constant 0 : i32
    %c0_i32_0 = arith.constant 0 : i32
    %c0_i32_1 = arith.constant 0 : i32
    return %c0_i32, %c0_i32_0 : i32, i32
  }
  func.func @transform_8(%arg0: i32) -> (i32, i32) {
    %c0_i32 = arith.constant 0 : i32
    %c0_i32_0 = arith.constant 0 : i32
    %c0_i32_1 = arith.constant 0 : i32
    return %c0_i32, %c0_i32_0 : i32, i32
  }
  func.func @transform_9(%arg0: i32) -> (i32, i32) {
    %c0_i32 = arith.constant 0 : i32
    %c0_i32_0 = arith.constant 0 : i32
    %c0_i32_1 = arith.constant 0 : i32
    return %c0_i32, %c0_i32_0 : i32, i32
  }
  func.func @transform_10(%arg0: i32) -> (i32, i32) {
    %c0_i32 = arith.constant 0 : i32
    %c0_i32_0 = arith.constant 0 : i32
    %c0_i32_1 = arith.constant 0 : i32
    return %c0_i32, %c0_i32_0 : i32, i32
  }
  func.func @transform_11(%arg0: i32) -> (i32, i32) {
    %c0_i32 = arith.constant 0 : i32
    %c0_i32_0 = arith.constant 0 : i32
    return %arg0, %c0_i32 : i32, i32
  }
}

</mosaic_0001>

<bundles_post_ra>
// kernel: tpu_custom_call.1
= control target key start
LH: loop header
LB: loop body
LE: loop exit
PB: predicated region body
PF: predicated region fallthrough
CT: control target
= control target key end

     0   :  { %s845_s0 = inlined_call_operand.vmem [shape: f32[8,24], index: 0, kind: input, shape index: {}]   ;;  %s846_s1 = inlined_call_operand.vmem [shape: f32[8,8], index: 1, kind: input, shape index: {}]   ;;  %s847_s2 = inlined_call_operand.hbm [shape: f32[24,32], index: 2, kind: input, shape index: {}]   ;;  %s848_s3 = inlined_call_operand.hbm [shape: f32[8,32], index: 3, kind: input, shape index: {}]   ;;  %s849_s4 = inlined_call_operand.vmem [shape: f32[1,32], index: 4, kind: input, shape index: {}]   ;;  %s850_s5 = inlined_call_operand.vmem [shape: f32[32,32], index: 5, kind: input, shape index: {}]   ;;  %s851_s6 = inlined_call_operand.vmem [shape: f32[1,32], index: 6, kind: input, shape index: {}]   ;;  %s852_s7 = inlined_call_operand.hbm [shape: f32[32,32], index: 7, kind: input, shape index: {}]   ;;  %s853_s8 = inlined_call_operand.vmem [shape: f32[1,32], index: 8, kind: input, shape index: {}]   ;;  %s854_s9 = inlined_call_operand.vmem [shape: f32[32,1], index: 9, kind: input, shape index: {}]   ;;  %s855_s10 = inlined_call_operand.<no memory space> [shape: f32[1,1], index: 10, kind: input, shape index: {}]   ;;  %s856_s11 = inlined_call_operand.vmem [shape: f32[8,1], index: 11, kind: output, shape index: {}]  }
   0x1   :  { %v16_v0 = vstv %s855_s10 }
   0x2   :  { %17 = vst [vmem:[#allocation2] sm:$0x1] %v16_v0 }
   0x3   :  { %18 = vsyncpa [#allocation4], 0 }
   0x4   :  { %19 = vsyncpa [#allocation6], 0  ;;  %s681_s19 = smov [#allocation5]   ;;  %s682_s21 = smov [#allocation3]  }
   0x5   :  { %s42_s20 = sshll.u32 %s681_s19, 4  ;;  %s29_s22 = sshll.u32 %s682_s21, 4  ;;  %s43_s20 = int_to_ptr.vmem [resolvable:$true] %s42_s20  ;;  %s752_s22 = int_to_ptr.vmem [resolvable:$true] %s29_s22 }
   0x6   :  { %s611_s25 = scalar_lea.hbm %s848_s3, 128 }
   0x7   :  { %p612_p0 = scmp.ne.s32.totalorder %s848_s3, %s611_s25  ;;  %p615_p1 = scmp.lt.u32.totalorder %s611_s25, %s848_s3 }
   0x9   :  { %p617_p2 = pnand %p615_p1, %p612_p0 }
   0xb   :  { %620 = shalt.err (!%p617_p2)
}
   0xc   :  { %s621_s29 = scalar_lea.vmem %s43_s20, 128  ;;  %p626_p4 = scmp.lt.s32.totalorder %s43_s20, %s43_s20 }
   0xd   :  { %p622_p3 = scmp.ne.s32.totalorder %s43_s20, %s621_s29  ;;  %p627_p5 = scmp.lt.s32.totalorder %s621_s29, %s621_s29 }
   0xf   :  { %p628_p6 = por %p627_p5, %p626_p4 }
  0x11   :  { %p629_p7 = pnand %p628_p6, %p622_p3 }
  0x13   :  { %632 = shalt.err (!%p629_p7)
}
  0x14   :  { %45 = dma.hbm_to_vmem [thread:$0]  %s848_s3, 128, %s43_s20, [#allocation6]  }
  0x15   :  { %s633_s15 = scalar_lea.hbm %s847_s2, 384 }
  0x16   :  { %p634_p8 = scmp.ne.s32.totalorder %s847_s2, %s633_s15  ;;  %p637_p9 = scmp.lt.u32.totalorder %s633_s15, %s847_s2 }
  0x18   :  { %p639_p10 = pnand %p637_p9, %p634_p8 }
  0x1a   :  { %642 = shalt.err (!%p639_p10)
}
  0x1b   :  { %s643_s21 = scalar_lea.vmem %s752_s22, 384  ;;  %p648_p12 = scmp.lt.s32.totalorder %s752_s22, %s752_s22 }
  0x1c   :  { %p644_p11 = scmp.ne.s32.totalorder %s752_s22, %s643_s21  ;;  %p649_p13 = scmp.lt.s32.totalorder %s643_s21, %s643_s21 }
  0x1e   :  { %p650_p0 = por %p649_p13, %p648_p12 }
  0x20   :  { %p651_p1 = pnand %p650_p0, %p644_p11 }
  0x22   :  { %654 = shalt.err (!%p651_p1)
}
  0x23   :  { %s683_s3 = smov 128   ;;  %s684_s20 = smov 8  }
  0x24   :  { %35 = dma.hbm_to_vmem [thread:$0]  %s847_s2, 384, %s752_s22, [#allocation4], %s683_s3, %s683_s3, %s684_s20  }
  0x25   :  { %s685_s25 = smov [#allocation7]   ;;  %s655_s10 = scalar_lea.hbm %s852_s7, 512 }
  0x26   :  { %s57_s26 = sshll.u32 %s685_s25, 4  ;;  %p656_p2 = scmp.ne.s32.totalorder %s852_s7, %s655_s10  ;;  %s58_s26 = int_to_ptr.vmem [resolvable:$true] %s57_s26 }
  0x27   :  { %p659_p3 = scmp.lt.u32.totalorder %s655_s10, %s852_s7 }
  0x29   :  { %p661_p4 = pnand %p659_p3, %p656_p2 }
  0x2b   :  { %664 = shalt.err (!%p661_p4)
}
  0x2c   :  { %s665_s14 = scalar_lea.vmem %s58_s26, 512  ;;  %p670_p6 = scmp.lt.s32.totalorder %s58_s26, %s58_s26 }
  0x2d   :  { %p666_p5 = scmp.ne.s32.totalorder %s58_s26, %s665_s14  ;;  %p671_p7 = scmp.lt.s32.totalorder %s665_s14, %s665_s14 }
  0x2f   :  { %p672_p8 = por %p671_p7, %p670_p6 }
  0x31   :  { %p673_p9 = pnand %p672_p8, %p666_p5 }
  0x33   :  { %676 = shalt.err (!%p673_p9)
}
  0x34   :  { %63 = dma.hbm_to_vmem [thread:$0]  %s852_s7, 512, %s58_s26, [#allocation6], %s683_s3, %s683_s3, %s684_s20  }
  0x35   :  { %677 = dma.done.wait [#allocation4], 384  }
  0x36   :  { %678 = vsyncadd [#allocation4], 4294966912 }
  0x37   :  { %679 = dma.done.wait [#allocation6], 640  }
  0x38   :  { %680 = vsyncadd [#allocation6], 4294966656  ;;  %v686_v1 = vmov 0.0   ;;  %vm687_vm0 = vmmov 0   ;;  %v688_v2 = vmov 0.0|0.0   ;;  %vm85_vm1 = vcmask 64512  }
  0x39   :  { %535 = vmatprep.subr.mxu1 %v686_v1  ;;  %537 = vmatprep.mubr.msk.f32.mxu1 %vm687_vm0, %v686_v1  ;;  %v84_v3 = vld [vmem:[#allocation5] sm:$0xff]  ;;  %v80_v5 = vld [vmem:[#allocation3] sm:$0xff]  ;;  %v81_v6 = vld [vmem:[#allocation3 + $0x8] sm:$0xff]  ;;  %vm159_vm2 = vcmask 195584   ;;  %vm253_vm3 = vcmask 261120   ;;  %vm497_vm4 = vcmask 7168  }
  0x3a   :  { %585 = vmatprep.subr.bf16.mxu0 %v688_v2  ;;  %557 = vmatprep.mubr.msk.f32.mxu0 %vm687_vm0, %v686_v1  ;;  %v83_v4 = vld [vmem:[%s846_s1] sm:$0xff]  ;;  %v583_v7 = vpack.c.bf16 %v81_v6, %v80_v5  ;;  %v82_v8 = vld [vmem:[#allocation3 + $0x10] sm:$0xff]  ;;  %v243_v11 = vld [vmem:[%s850_s5 + $0x8] sm:$0xff] }
  0x3b   :  { %536 = vmatpush3.msra.mxu1 %v84_v3  ;;  %v79_v9 = vld [vmem:[%s845_s0] sm:$0xff]  ;;  %v244_v13 = vld [vmem:[%s850_s5 + $0x10] sm:$0xff]  ;;  %v245_v14 = vld [vmem:[%s850_s5 + $0x18] sm:$0xff] }
  0x3c   :  { %538 = vmatmul.mubr.msk.f32.vlgmr.msra.gmra.mrb[0].mxu1 %vm85_vm1, %v83_v4  ;;  %582 = vmatprep.subr.bf16.mxu1 %v688_v2  ;;  %v242_v10 = vld [vmem:[%s850_s5] sm:$0xff]  ;;  %v589_v15 = vpack.c.bf16 %v245_v14, %v244_v13  ;;  %v329_v17 = vld [vmem:[#allocation7 + $0x8] sm:$0xff]  ;;  %v330_v27 = vld [vmem:[#allocation7 + $0x10] sm:$0xff] }
  0x3d   :  { %546 = vmatprep.mubr.msk.f32.mxu1 %vm687_vm0, %v686_v1  ;;  %584 = vmatpush3.bf16.msra.mxu1 %v583_v7  ;;  %v586_v12 = vpack.c.bf16 %v243_v11, %v242_v10  ;;  %v328_v16 = vld [vmem:[#allocation7] sm:$0xff]  ;;  %v507_v22 = vld [vmem:[%s849_s4] ss:$0 sm:$0xff]  ;;  %v415_v38 = vld [vmem:[%s854_s9 + $0x10] sm:$0xff] }
  0x3e   :  { %544 = vmatprep.subr.mxu1 %v686_v1  ;;  %v592_v18 = vpack.c.bf16 %v329_v17, %v328_v16  ;;  %v331_v28 = vld [vmem:[#allocation7 + $0x18] sm:$0xff]  ;;  %v414_v31 = vld [vmem:[%s854_s9 + $0x8] sm:$0xff] }
  0x3f   :  { %587 = vmatpush3.bf16.msra.mxu0 %v586_v12  ;;  %v595_v29 = vpack.c.bf16 %v331_v28, %v330_v27  ;;  %v413_v30 = vld [vmem:[%s854_s9] sm:$0xff]  ;;  %v416_v39 = vld [vmem:[%s854_s9 + $0x18] sm:$0xff] }
  0x40   :  { %588 = vmatprep.subr.bf16.mxu0 %v688_v2  ;;  %v598_v32 = vpack.c.bf16 %v414_v31, %v413_v30  ;;  %v508_v33 = vld [vmem:[%s851_s6] ss:$0 sm:$0xff]  ;;  %v601_v40 = vpack.c.bf16 %v416_v39, %v415_v38 }
  0x41   :  { %545 = vmatpush3.msra.mxu1 %v82_v8  ;;  %v510_v41 = vld [vmem:[%s853_s8] ss:$0 sm:$0xff] }
  0x42   :  { %547 = vmatmul.mubr.msk.f32.vlgmr.msra.gmra.mrb[2].mxu1 %vm159_vm2, %v79_v9  ;;  %591 = vmatprep.subr.bf16.mxu1 %v688_v2  ;;  %v512_v46 = vld [vmem:[#allocation2] ss:$0 sm:$0xff] }
  0x43   :  { %568 = vmatprep.mubr.msk.f32.mxu1 %vm687_vm0, %v686_v1  ;;  %590 = vmatpush3.bf16.msra.mxu0 %v589_v15 }
  0x44   :  { %597 = vmatprep.subr.bf16.mxu0 %v688_v2  ;;  %593 = vmatpush3.bf16.msra.mxu1 %v592_v18 }
  0x45   :  { %594 = vmatprep.subr.bf16.mxu1 %v688_v2 }
  0x48   :  { %596 = vmatpush3.bf16.msra.mxu1 %v595_v29 }
 0x10f   :  { %v155_v19 = vpop.f32.mrb[0].mxu1 }
 0x110   :  { %v539_v20 = vpop.f32.mrb[1].mxu1 }
 0x115   :  { %v229_v21 = vpop.f32.mrb[2].mxu1 }
 0x116   :  { %v230_v23 = vadd.f32 %v229_v21, %v155_v19  ;;  %v548_v24 = vpop.f32.mrb[3].mxu1 }
 0x118   :  { %v240_v25 = vadd.f32 %v507_v22, %v230_v23 }
 0x11a   :  { %v241_v26 = vmax.f32 %v240_v25, 0.0 }
 0x11c   :  { %558 = vmatmul.mubr.msk.f32.vlgmr.msra.gmra.mrb[0].mxu0 %vm253_vm3, %v241_v26 }
 0x11d   :  { %579 = vmatprep.mubr.msk.f32.mxu0 %vm687_vm0, %v686_v1  ;;  %599 = vmatpush3.bf16.msra.mxu0 %v598_v32 }
 0x11e   :  { %600 = vmatprep.subr.bf16.mxu0 %v688_v2 }
 0x121   :  { %602 = vmatpush3.bf16.msra.mxu0 %v601_v40 }
 0x1ef   :  { %v323_v34 = vpop.f32.mrb[0].mxu0 }
 0x1f0   :  { %v324_v35 = vadd.f32 %v508_v33, %v323_v34  ;;  %v559_v36 = vpop.f32.mrb[1].mxu0 }
 0x1f2   :  { %v327_v37 = vmax.f32 %v324_v35, 0.0 }
 0x1f4   :  { %569 = vmatmul.mubr.msk.f32.vlgmr.msra.gmra.mrb[4].mxu1 %vm253_vm3, %v327_v37 }
 0x2c7   :  { %v408_v42 = vpop.f32.mrb[4].mxu1 }
 0x2c8   :  { %v409_v43 = vadd.f32 %v510_v41, %v408_v42  ;;  %v570_v44 = vpop.f32.mrb[5].mxu1 }
 0x2ca   :  { %v412_v45 = vmax.f32 %v409_v43, 0.0 }
 0x2cc   :  { %580 = vmatmul.mubr.msk.f32.vlgmr.msra.gmra.mrb[2].mxu0 %vm253_vm3, %v412_v45 }
 0x39f   :  { %v493_v47 = vpop.f32.mrb[2].mxu0 }
 0x3a0   :  { %v494_v48 = vadd.f32 %v512_v46, %v493_v47  ;;  %v581_v49 = vpop.f32.mrb[3].mxu0 }
 0x3a2   :  { %498 = vst.msk [vmem:[%s856_s11] sm:$0xff] %vm497_vm4, %v494_v48 }
 0x3a3   :  { %503 = vsyncpa [#allocation4], 1 }
 0x3a4   :  { %504 = vsyncpa [#allocation6], 1 }

</bundles_post_ra>
